<compile_context>
chip_gen: v7x
topology: tpu7x:2x2x1
jax: 0.10.0
libtpu: 0.0.40
codegen_flags: <defaults>
</compile_context>

<pallas_src>
import functools

import numpy as np

import jax
import jax.numpy as jnp
from jax.experimental import pallas as pl
from jax.experimental.pallas import tpu as pltpu

_LANES = 128
_ROW_ALIGN = 32                          # legal min sublane tile for f32/bf16/int8 outputs
_COL_CANDIDATES = (2048, 1024, 512, 256, 128)
_DEFAULT_MIN_PALLAS_ELEMS = 64 * 1024    # below this, XLA fusion beats a custom call


# ---------------------------------------------------------------------------
# Chip profile (tile size + dimension semantics), resolved once.
# ---------------------------------------------------------------------------
@functools.lru_cache(maxsize=1)
def _chip_profile():
    kind = ""
    try:
        kind = (getattr(jax.devices()[0], "device_kind", "") or "").lower()
    except Exception:
        pass
    is_v7 = ("v7" in kind) or ("tpu7" in kind) or ("tpu 7" in kind)
    if "v5" in kind:
        tile_bytes = 2 * 1024 * 1024     # 4 bufs x 2 MiB = 8 MiB < 16 MiB scoped default
    elif ("v6" in kind) or is_v7:
        tile_bytes = 4 * 1024 * 1024     # 4 bufs x 4 MiB = 16 MiB < 32 MiB scoped default
    else:
        tile_bytes = 2 * 1024 * 1024     # conservative default
    return tile_bytes, is_v7


# ---------------------------------------------------------------------------
# Elementwise-safety analysis of the lambda (jaxpr inspection).
# ---------------------------------------------------------------------------
_ELEMENTWISE_PRIMS = frozenset({
    "add", "sub", "mul", "div", "rem", "max", "min", "pow", "integer_pow",
    "neg", "abs", "sign", "floor", "ceil", "round", "exp", "exp2", "expm1",
    "log", "log1p", "log2", "sqrt", "rsqrt", "cbrt", "square", "logistic",
    "tanh", "sin", "cos", "tan", "asin", "acos", "atan", "atan2",
    "sinh", "cosh", "asinh", "acosh", "atanh", "erf", "erfc", "erf_inv",
    "convert_element_type", "bitcast_convert_type", "reduce_precision",
    "eq", "ne", "lt", "le", "gt", "ge", "select_n", "clamp",
    "and", "or", "xor", "not", "shift_left",
    "shift_right_logical", "shift_right_arithmetic",
    "is_finite", "nextafter", "copy", "real", "imag",
})
# Call-like primitives we recurse into (anything else with sub-jaxprs — scan,
# while, cond, ... — is rejected: it may be position/sequence dependent).
_CALL_PRIMS = frozenset({
    "pjit", "closed_call", "custom_jvp_call", "custom_jvp_call_jaxpr",
    "custom_vjp_call", "custom_vjp_call_jaxpr", "remat", "remat2", "checkpoint",
})


def _sub_jaxprs(params):
    """Collect (jaxpr, consts) pairs hidden inside an eqn's params."""
    found = []
    for v in params.values():
        vs = v if isinstance(v, (tuple, list)) else (v,)
        for u in vs:
            if hasattr(u, "eqns"):                                   # Jaxpr
                found.append((u, ()))
            elif hasattr(u, "jaxpr") and hasattr(u.jaxpr, "eqns"):    # ClosedJaxpr
                found.append((u.jaxpr, tuple(getattr(u, "consts", ()))))
    return found


def _walk_jaxpr(jaxpr, sig):
    """True iff every eqn is elementwise-safe; appends (prim, literal-values) to sig."""
    for eqn in jaxpr.eqns:
        name = eqn.primitive.name
        lits = []
        for v in eqn.invars:
            val = getattr(v, "val", None)                # Literal -> .val, Var -> None
            if val is not None and np.ndim(val) == 0:
                lits.append(repr(np.asarray(val).item()))
        sig.append((name, tuple(lits)))
        if name in _CALL_PRIMS:
            subs = _sub_jaxprs(eqn.params)
            if not subs:
                return False
            for inner, consts in subs:
                for c in consts:
                    if np.size(c) > 1:                   # captured tensor constant
                        return False
                    sig.append(("const", repr(np.asarray(c).reshape(()).item())))
                if not _walk_jaxpr(inner, sig):
                    return False
        elif name == "broadcast_in_dim":
            if eqn.invars[0].aval.size != 1:             # only scalar broadcasts are safe
                return False
        elif name not in _ELEMENTWISE_PRIMS:
            return False
    return True


def _jaxpr_signature(lambd, shape, dtype):
    """Returns (signature, ok). ok=False => not provably elementwise for this shape."""
    try:
        try:
            closed = jax.make_jaxpr(lambd)(jax.ShapeDtypeStruct(shape, dtype))
        except Exception:
            closed = jax.make_jaxpr(lambd)(jnp.zeros(shape, dtype))
        sig = []
        for c in closed.consts:
            if np.size(c) > 1:                            # closed-over tensor => unsafe
                return None, False
            sig.append(("const", repr(np.asarray(c).reshape(()).item())))
        ok = _walk_jaxpr(closed.jaxpr, sig)
        return tuple(sig), ok
    except Exception:
        return None, False


def _analyze_lambda(lambd, shape, dtype, elementwise_flag):
    """Returns (use_pallas, out_dtype)."""
    if elementwise_flag is False:
        return False, None
    try:
        out = jax.eval_shape(lambd, jax.ShapeDtypeStruct(shape, dtype))
    except Exception:
        return False, None
    if jax.tree_util.tree_structure(out).num_leaves != 1 or not hasattr(out, "shape"):
        return False, None
    if tuple(out.shape) != tuple(shape):
        return False, None
    out_dtype = out.dtype
    if elementwise_flag is True:                          # explicit user opt-in
        return True, out_dtype

    sig, ok = _jaxpr_signature(lambd, shape, dtype)
    if not ok:
        return False, None
    # Shape-invariance guard: reject lambdas whose jaxpr bakes values from the
    # input shape (e.g. `t / t.shape[-1]`) or that are rank-specialized.  The
    # (8, 128) alt also matches the rank the lambda will actually see in-kernel.
    alts = [(8, _LANES)]
    if len(shape) >= 1 and shape[-1] > 0:
        alts.append(tuple(shape[:-1]) + (shape[-1] + 1,))
    for alt in alts:
        alt_sig, alt_ok = _jaxpr_signature(lambd, alt, dtype)
        if (not alt_ok) or alt_sig != sig:
            return False, None
    return True, out_dtype


# ---------------------------------------------------------------------------
# The Pallas kernel + launcher.
# ---------------------------------------------------------------------------
def _lambda_kernel(x_ref, o_ref, *, lambd):
    # Elementwise hot path: apply the traced lambda to the whole VMEM tile.
    o_ref[...] = lambd(x_ref[...]).astype(o_ref.dtype)


def _run_pallas_2d(x2d, out_dtype, lambd, *, donate_input=False):
    """Apply `lambd` elementwise over a lane-dense 2-D slab via Pallas."""
    rows, cols = x2d.shape
    in_item = jnp.dtype(x2d.dtype).itemsize
    out_item = jnp.dtype(out_dtype).itemsize
    tile_bytes, is_v7 = _chip_profile()

    block_rows = tile_bytes // (cols * max(in_item, out_item))
    block_rows = (block_rows // _ROW_ALIGN) * _ROW_ALIGN
    if block_rows < _ROW_ALIGN or block_rows >= rows:
        block_rows = rows                 # single full-extent block (always legal)
    grid = (pl.cdiv(rows, block_rows),)   # partial last block handled by Pallas

    # v7x: shard the row blocks across both TensorCores so both issue DMAs
    # (a single TC's DMA engines can't saturate 3.2 TB/s HBM).  1-TC chips keep
    # "arbitrary" — parallel vs arbitrary is a measured no-op there.
    if is_v7 and grid[0] > 1 and hasattr(pltpu, "CORE_PARALLEL"):
        semantics = (pltpu.CORE_PARALLEL,)
    else:
        semantics = ("arbitrary",)

    kwargs = {}
    # Aliasing is opt-in: if the caller still needs x, XLA inserts a defensive
    # full copy which would regress this mem-bound op.
    if donate_input and jnp.dtype(x2d.dtype) == jnp.dtype(out_dtype):
        kwargs["input_output_aliases"] = {0: 0}
    try:
        kwargs["cost_estimate"] = pl.CostEstimate(
            flops=rows * cols,
            transcendentals=0,
            bytes_accessed=rows * cols * (in_item + out_item))
    except Exception:
        pass

    return pl.pallas_call(
        functools.partial(_lambda_kernel, lambd=lambd),
        out_shape=jax.ShapeDtypeStruct((rows, cols), out_dtype),
        grid=grid,
        in_specs=[pl.BlockSpec((block_rows, cols), lambda i: (i, 0))],
        out_specs=pl.BlockSpec((block_rows, cols), lambda i: (i, 0)),
        compiler_params=pltpu.CompilerParams(dimension_semantics=semantics),
        **kwargs,
    )(x2d)


# ---------------------------------------------------------------------------
# Public wrapper: equivalent of LambdaLayer(lambd).forward
# ---------------------------------------------------------------------------
def make_lambda_layer(lambd, *, elementwise=None, donate_input=False,
                      min_pallas_elems=_DEFAULT_MIN_PALLAS_ELEMS):
    """Returns a JAX callable equivalent to LambdaLayer(lambd).forward.

    elementwise: True  -> user asserts lambd is elementwise (forces kernel path)
                 False -> always run plain JAX
                 None  -> auto-detect via jaxpr inspection (safe default)
    """
    analysis_cache = {}

    def _analysis(shape, dtype):
        key = (tuple(shape), str(jnp.dtype(dtype)))
        if key not in analysis_cache:
            analysis_cache[key] = _analyze_lambda(lambd, shape, dtype, elementwise)
        return analysis_cache[key]

    def apply(x):
        x = jnp.asarray(x)
        n = x.size
        use_pallas, out_dtype = _analysis(x.shape, x.dtype)

        if (not use_pallas) or n == 0 or n < min_pallas_elems:
            # TODO(synk): non-elementwise lambdas (reductions, softmax, the
            # ResNet option-A pad/stride shortcut, ...) run as plain JAX.
            return lambd(x)

        orig_shape = x.shape
        flat = x.reshape(-1)

        # Fast path: widest lane-dense width that divides n -> no pad, no slice,
        # no stitch; one HBM read + one HBM write.
        cols = next((c for c in _COL_CANDIDATES if n % c == 0), None)
        if cols is not None:
            out2d = _run_pallas_2d(flat.reshape(-1, cols), out_dtype, lambd,
                                   donate_input=donate_input)
            return out2d.reshape(orig_shape)

        # Ragged fallback: run the widest lane-dense prefix through Pallas and
        # compute the short (< 2048-elem) tail with plain JAX, then stitch.
        # Avoids the old whole-array pad(mode="edge") + trailing slice (3x HBM
        # traffic) and never feeds synthetic padded values to lambd.
        # TODO(synk): a single pallas_call with a masked final store against a
        # flat output would remove the remaining stitch copy as well.
        cols = _COL_CANDIDATES[0]
        n_prefix = (n // cols) * cols
        if n_prefix == 0:
            return lambd(x)
        head = _run_pallas_2d(flat[:n_prefix].reshape(-1, cols), out_dtype, lambd,
                              donate_input=donate_input).reshape(-1)
        tail = lambd(flat[n_prefix:].reshape(1, -1)).reshape(-1).astype(out_dtype)
        return jnp.concatenate([head, tail]).reshape(orig_shape)

    return apply


# ---------------------------------------------------------------------------
# Self-test
# ---------------------------------------------------------------------------
if __name__ == "__main__":
    key = jax.random.PRNGKey(0)

    # Representative deterministic elementwise lambda (no parameters).
    lambd = lambda t: jax.nn.relu(t) * 2.0 + 1.0

    # Small NCHW inputs consistent with how LambdaLayer sits in conv nets.
    x_small = jax.random.normal(key, (2, 4, 16, 16), dtype=jnp.float32)
    # Ragged size -> exercises the prefix/tail fallback path.
    x_ragged = jax.random.normal(jax.random.fold_in(key, 1), (3, 5, 17, 13),
                                 dtype=jnp.float32)

    # min_pallas_elems=0 forces the Pallas path even for these small tensors.
    layer = make_lambda_layer(lambd, min_pallas_elems=0)
    for x in (x_small, x_ragged):
        ref = lambd(x)                        # reference computed up front
        out = jax.block_until_ready(layer(x))
        assert out.shape == x.shape and out.dtype == ref.dtype
        assert jnp.allclose(out, ref, atol=1e-6, rtol=1e-6), "mismatch vs reference"

    # Dtype-changing lambda (f32 -> bf16); explicit elementwise=True guarantees
    # the Pallas kernel path runs regardless of the auto-detector.
    lambd_cast = lambda t: (t * 0.5).astype(jnp.bfloat16)
    layer_cast = make_lambda_layer(lambd_cast, elementwise=True, min_pallas_elems=0)
    ref_c = lambd_cast(x_small)
    out_c = jax.block_until_ready(layer_cast(x_small))
    assert out_c.dtype == jnp.bfloat16 and out_c.shape == x_small.shape
    assert jnp.allclose(out_c.astype(jnp.float32), ref_c.astype(jnp.float32),
                        atol=1e-2, rtol=1e-2)

    # Shape-preserving but NON-elementwise lambda: must auto-fallback to plain
    # JAX (previously this would have been silently mis-tiled).
    lambd_sm = lambda t: jax.nn.softmax(t, axis=-1)
    layer_sm = make_lambda_layer(lambd_sm, min_pallas_elems=0)
    out_sm = jax.block_until_ready(layer_sm(x_small))
    assert jnp.allclose(out_sm, lambd_sm(x_small), atol=1e-6, rtol=1e-6)

    print("KERNEL_OK")
</pallas_src>

<mosaic_0001>
module attributes {stable_mosaic.version = 11 : i64} {
  func.func @_lambda_kernel(%arg0: i32, %arg1: memref<1x2048xf32, #tpu.memory_space<vmem>>, %arg2: memref<1x2048xbf16, #tpu.memory_space<vmem>>) attributes {dimension_semantics = [#tpu.dimension_semantics<arbitrary>], iteration_bounds = array<i64: 1>, scalar_prefetch = 0 : i64, scratch_operands = 0 : i64, tpu.core_type = #tpu.core_type<tc>, window_params = [{transform_indices = @transform_0, window_bounds = array<i64: 1, 2048>}, {transform_indices = @transform_1, window_bounds = array<i64: 1, 2048>}]} {
    %c0 = arith.constant 0 : index
    %c0_0 = arith.constant 0 : index
    %0 = vector.load %arg1[%c0, %c0_0] : memref<1x2048xf32, #tpu.memory_space<vmem>>, vector<1x2048xf32>
    %cst = arith.constant 5.000000e-01 : f32
    %1 = vector.broadcast %cst : f32 to vector<1x2048xf32>
    %2 = arith.mulf %0, %1 : vector<1x2048xf32>
    %3 = arith.truncf %2 : vector<1x2048xf32> to vector<1x2048xbf16>
    %c0_1 = arith.constant 0 : index
    %c0_2 = arith.constant 0 : index
    %4 = vector.load %arg2[%c0_1, %c0_2] : memref<1x2048xbf16, #tpu.memory_space<vmem>>, vector<1x2048xbf16>
    tpu.vector_store %arg2[%c0_1, %c0_2], %3 {strides = array<i32>} : memref<1x2048xbf16, #tpu.memory_space<vmem>>, vector<1x2048xbf16>,
    return
  }
  func.func @transform_0(%arg0: i32) -> (i32, i32) {
    %c0_i32 = arith.constant 0 : i32
    %c0_i32_0 = arith.constant 0 : i32
    return %arg0, %c0_i32 : i32, i32
  }
  func.func @transform_1(%arg0: i32) -> (i32, i32) {
    %c0_i32 = arith.constant 0 : i32
    %c0_i32_0 = arith.constant 0 : i32
    return %arg0, %c0_i32 : i32, i32
  }
}

</mosaic_0001>

<bundles_post_ra>
// kernel: tpu_custom_call.1
= control target key start
LH: loop header
LB: loop body
LE: loop exit
PB: predicated region body
PF: predicated region fallthrough
CT: control target
= control target key end

     0   :  { %6 = vsyncpa [#allocation3], 0  ;;  %s455_s0 = inlined_call_operand.hbm [shape: f32[1,2048], index: 0, kind: input, shape index: {}]   ;;  %s456_s1 = inlined_call_operand.hbm [shape: bf16[1,2048], index: 1, kind: output, shape index: {}]  }
   0x1   :  { %7 = vsyncpa [#allocation4], 0  ;;  %s350_s6 = smov [#allocation2]   ;;  %s302_s10 = scalar_lea.hbm %s455_s0, 256 }
   0x2   :  { %s14_s7 = sshll.u32 %s350_s6, 4  ;;  %p303_p0 = scmp.ne.s32.totalorder %s455_s0, %s302_s10  ;;  %s15_s7 = int_to_ptr.vmem [resolvable:$true] %s14_s7 }
   0x3   :  { %p306_p1 = scmp.lt.u32.totalorder %s302_s10, %s455_s0 }
   0x5   :  { %p308_p2 = pnand %p306_p1, %p303_p0 }
   0x7   :  { %311 = shalt.err (!%p308_p2)
}
   0x8   :  { %s312_s15 = scalar_lea.vmem %s15_s7, 256  ;;  %p317_p4 = scmp.lt.s32.totalorder %s15_s7, %s15_s7 }
   0x9   :  { %p313_p3 = scmp.ne.s32.totalorder %s15_s7, %s312_s15  ;;  %p318_p5 = scmp.lt.s32.totalorder %s312_s15, %s312_s15 }
   0xb   :  { %p319_p6 = por %p318_p5, %p317_p4 }
   0xd   :  { %p320_p7 = pnand %p319_p6, %p313_p3 }
   0xf   :  { %323 = shalt.err (!%p320_p7)
}
  0x10   :  { %17 = dma.hbm_to_vmem [thread:$0]  %s455_s0, 256, %s15_s7, [#allocation3]  }
  0x11   :  { %346 = dma.done.wait [#allocation3], 256  }
  0x12   :  { %347 = vsyncadd [#allocation3], 4294967040  ;;  %v27_v0 = vlaneseq  ;;  %vm239_vm0 = vcmask 1040384   ;;  %vm242_vm1 = vcmask 1041409   ;;  %v351_v1 = vmov 1966171168  }
  0x13   :  { %v144_v2 = vunpack.c.l.s4 %v351_v1  ;;  %vm240_vm2 = vsmask.f32 256  ;;  %vm243_vm3 = vsmask.f32 1280  ;;  %vm246_vm5 = vcmask 1042434   ;;  %v21_v11 = vld [vmem:[#allocation2] sm:$0xff] }
  0x14   :  { %v375_v3 = vshrl.u32 %v27_v0, 7  ;;  %vm377_vm4 = vmand %vm239_vm0, %vm240_vm2  ;;  %vm247_vm6 = vsmask.f32 2304  ;;  %vm250_vm9 = vcmask 1043459   ;;  %vm251_vm10 = vsmask.f32 3328 }
  0x15   :  { %vm244_vm7 = vmand %vm242_vm1, %vm243_vm3  ;;  %v145_v5 = vunpack.c.0.s8 %v144_v2  ;;  %vm254_vm12 = vcmask 1044484   ;;  %vm255_vm13 = vsmask.f32 4352  ;;  %vm258_vm14 = vcmask 1045509   ;;  %v22_v19 = vld [vmem:[#allocation2 + $0x8] sm:$0xff]  ;;  %v270_v61 = vld [vmem:[#allocation5] sm:$0xff] }
  0x16   :  { %vm245_vm8 = vmor %vm244_vm7, %vm377_vm4  ;;  %v29_v6 = vsub.s32 0, %v375_v3  ;;  %v33_v7 = vsub.s32 1, %v375_v3  ;;  %v37_v8 = vsub.s32 2, %v375_v3  ;;  %v41_v9 = vsub.s32 3, %v375_v3  ;;  %s352_s0 = smov [#allocation5]   ;;  %v273_v4 = vld [vmem:[#allocation5 + $0x8] sm:$0xff] }
  0x17   :  { %vm248_vm11 = vmand %vm246_vm5, %vm247_vm6  ;;  %v45_v12 = vsub.s32 4, %v375_v3  ;;  %v49_v13 = vsub.s32 5, %v375_v3  ;;  %v53_v14 = vsub.s32 6, %v375_v3  ;;  %v57_v15 = vsub.s32 7, %v375_v3  ;;  %s282_s18 = sshll.u32 %s352_s0, 4  ;;  %s283_s18 = int_to_ptr.vmem [resolvable:$true] %s282_s18 }
  0x18   :  { %vm387_vm15 = vmor %vm248_vm11, %vm245_vm8  ;;  %v23_v17 = vmul.f32 0.5, %v21_v11  ;;  %v148_v18 = vsub.s32 %v145_v5, %v375_v3  ;;  %vm259_vm2 = vsmask.f32 5376  ;;  %vm262_vm3 = vcmask 1046534   ;;  %s324_s19 = scalar_lea.vmem %s283_s18, 256  ;;  %p329_p9 = scmp.lt.s32.totalorder %s283_s18, %s283_s18 }
  0x19   :  { %vm397_vm0 = vmand %vm250_vm9, %vm251_vm10  ;;  %vm263_vm5 = vsmask.f32 6400  ;;  %vm266_vm6 = vcmask 1047559   ;;  %vm267_vm7 = vsmask.f32 7424  ;;  %v24_v20 = vmul.f32 0.5, %v22_v19  ;;  %p325_p8 = scmp.ne.s32.totalorder %s283_s18, %s324_s19  ;;  %p330_p10 = scmp.lt.s32.totalorder %s324_s19, %s324_s19 }
  0x1a   :  { %vm253_vm1 = vmor %vm397_vm0, %vm387_vm15  ;;  %v30_v21 = vrot.slane %v23_v17, %v29_v6  ;;  %v34_v22 = vrot.slane %v23_v17, %v33_v7  ;;  %v38_v23 = vrot.slane %v23_v17, %v37_v8  ;;  %v42_v24 = vrot.slane %v23_v17, %v41_v9 }
  0x1b   :  { %vm256_vm4 = vmand %vm254_vm12, %vm255_vm13  ;;  %v46_v26 = vrot.slane %v23_v17, %v45_v12  ;;  %v50_v27 = vrot.slane %v23_v17, %v49_v13  ;;  %v54_v28 = vrot.slane %v23_v17, %v53_v14  ;;  %v58_v29 = vrot.slane %v23_v17, %v57_v15  ;;  %p331_p11 = por %p330_p10, %p329_p9 }
  0x1c   :  { %vm408_vm8 = vmor %vm256_vm4, %vm253_vm1  ;;  %v291_v31 = vpack.c.bf16 %v34_v22, %v30_v21  ;;  %v292_v32 = vpack.c.bf16 %v42_v24, %v38_v23  ;;  %v62_v33 = vrot.slane %v24_v20, %v29_v6  ;;  %v66_v34 = vrot.slane %v24_v20, %v33_v7 }
  0x1d   :  { %vm414_vm9 = vmand %vm258_vm14, %vm259_vm2  ;;  %v293_v35 = vpack.c.bf16 %v50_v27, %v46_v26  ;;  %v294_v36 = vpack.c.bf16 %v58_v29, %v54_v28  ;;  %v70_v37 = vrot.slane %v24_v20, %v37_v8  ;;  %v74_v38 = vrot.slane %v24_v20, %v41_v9  ;;  %p332_p12 = pnand %p331_p11, %p325_p8 }
  0x1e   :  { %vm261_vm10 = vmor %vm414_vm9, %vm408_vm8  ;;  %v149_v39 = vrot.slane %v291_v31, %v148_v18  ;;  %v156_v40 = vrot.slane %v292_v32, %v148_v18  ;;  %v78_v41 = vrot.slane %v24_v20, %v45_v12  ;;  %v82_v42 = vrot.slane %v24_v20, %v49_v13 }
  0x1f   :  { %vm264_vm11 = vmand %vm262_vm3, %vm263_vm5  ;;  %v163_v43 = vrot.slane %v293_v35, %v148_v18  ;;  %v170_v44 = vrot.slane %v294_v36, %v148_v18  ;;  %v86_v45 = vrot.slane %v24_v20, %v53_v14  ;;  %v90_v46 = vrot.slane %v24_v20, %v57_v15 }
  0x20   :  { %v171_v47 = vcombine.low %v149_v39, %v156_v40  ;;  %vm429_vm12 = vmor %vm264_vm11, %vm261_vm10  ;;  %v295_v49 = vpack.c.bf16 %v66_v34, %v62_v33  ;;  %v296_v50 = vpack.c.bf16 %v74_v38, %v70_v37  ;;  %v297_v51 = vpack.c.bf16 %v82_v42, %v78_v41 }
  0x21   :  { %v172_v52 = vcombine.low %v163_v43, %v170_v44  ;;  %vm435_vm13 = vmand %vm266_vm6, %vm267_vm7  ;;  %v298_v54 = vpack.c.bf16 %v90_v46, %v86_v45 }
  0x22   :  { %v179_v55 = vrot.slane %v171_v47, %v148_v18  ;;  %v198_v56 = vrot.slane %v295_v49, %v148_v18  ;;  %v205_v57 = vrot.slane %v296_v50, %v148_v18  ;;  %v212_v58 = vrot.slane %v297_v51, %v148_v18  ;;  %vm269_vm14 = vmor %vm435_vm13, %vm429_vm12 }
  0x23   :  { %v186_v59 = vrot.slane %v172_v52, %v148_v18  ;;  %v219_v60 = vrot.slane %v298_v54, %v148_v18 }
  0x24   :  { %v220_v62 = vcombine.low %v198_v56, %v205_v57 }
  0x25   :  { %v187_v63 = vcombine.low %v179_v55, %v186_v59  ;;  %v221_v0 = vcombine.low %v212_v58, %v219_v60 }
  0x26   :  { %v228_v1 = vrot.slane %v220_v62, %v148_v18 }
  0x27   :  { %v271_v2 = vsel %vm269_vm14, %v187_v63, %v270_v61  ;;  %v235_v3 = vrot.slane %v221_v0, %v148_v18 }
  0x28   :  { %272 = vst [vmem:[#allocation5] sm:$0xff] %v271_v2 }
  0x29   :  { %v236_v5 = vcombine.low %v228_v1, %v235_v3 }
  0x2b   :  { %v274_v6 = vsel %vm269_vm14, %v236_v5, %v273_v4 }
  0x2c   :  { %275 = vst [vmem:[#allocation5 + $0x8] sm:$0xff] %v274_v6 }
  0x2d   :  { %335 = shalt.err (!%p332_p12)
}
  0x2e   :  { %s336_s22 = scalar_lea.hbm %s456_s1, 256 }
  0x2f   :  { %p337_p13 = scmp.ne.s32.totalorder %s456_s1, %s336_s22  ;;  %p340_p0 = scmp.lt.u32.totalorder %s336_s22, %s456_s1 }
  0x31   :  { %p342_p1 = pnand %p340_p0, %p337_p13 }
  0x33   :  { %345 = shalt.err (!%p342_p1)
}
  0x34   :  { %285 = dma.vmem_to_hbm [thread:$0]  %s283_s18, 256, %s456_s1, [#allocation4]  }
  0x35   :  { %348 = dma.done.wait [#allocation4], 256  }
  0x36   :  { %349 = vsyncadd [#allocation4], 4294967040 }
  0x37   :  { %289 = vsyncpa [#allocation3], 1 }
  0x38   :  { %290 = vsyncpa [#allocation4], 1 }

</bundles_post_ra>
